<compile_context>
chip_gen: v6e
topology: v6e:2x2x1
jax: 0.10.0
libtpu: 0.0.40
codegen_flags: <defaults>
</compile_context>

<pallas_src>
import jax
import jax.numpy as jnp
from jax.experimental import pallas as pl
from jax.experimental.pallas import tpu as pltpu

LANES = 128
TARGET_BLOCK_BYTES = 2 * 1024 * 1024   # ~2 MiB of input per block per array
MAX_TM_ROWS = 8192                     # cap so in-kernel f32 temps stay small


def _block_rows(itemsize: int) -> int:
    tm = TARGET_BLOCK_BYTES // (LANES * itemsize)
    return min(MAX_TM_ROWS, max(8, (tm // 8) * 8))


def _make_small_kernel(inv_n: float):
    """Single-step kernel: whole slab resident in VMEM, straight-line body."""

    def kernel(a_ref, b_ref, o_ref):
        d = a_ref[...].astype(jnp.float32) - b_ref[...].astype(jnp.float32)
        o_ref[...] = (jnp.sum(d * d) * jnp.float32(inv_n)).reshape(1, 1)

    return kernel


def _make_tiled_kernel(tm: int, m_rows: int, steps: int, need_mask: bool):
    """Per-step VPU accumulate into a single-vreg accumulator, one final reduce."""

    def kernel(a_ref, b_ref, o_ref, acc_ref):
        s = pl.program_id(1)

        @pl.when(s == 0)
        def _():
            acc_ref[...] = jnp.zeros_like(acc_ref)

        d = a_ref[...].astype(jnp.float32) - b_ref[...].astype(jnp.float32)
        sq = d * d
        if need_mask:
            # Global row index of each row in this (possibly clamped) block.
            base = (pl.program_id(0) * steps + s) * tm
            row_ids = base + jax.lax.broadcasted_iota(jnp.int32, (tm, 1), 0)
            sq = jnp.where(row_ids < m_rows, sq, jnp.float32(0.0))
        # Groups of 8 rows map exactly onto (8,128) vregs, so this reshape is
        # layout-free and the reduce is plain vreg-wise VALU adds (no XLU),
        # all hidden under the input DMA.
        acc_ref[...] += jnp.sum(sq.reshape(tm // 8, 8, LANES), axis=0)

        @pl.when(s == pl.num_programs(1) - 1)
        def _():
            # Single cross-lane/cross-sublane reduce: this core's partial sum.
            o_ref[...] = jnp.sum(acc_ref[...]).reshape(1, 1, 1)

    return kernel


def mse_loss_pallas(pred: jax.Array, target: jax.Array) -> jax.Array:
    """mean((pred - target)**2) over all elements, computed in Pallas."""
    assert pred.shape == target.shape, "MSELoss requires matching shapes"
    n_elem = pred.size
    if n_elem == 0:
        # torch.nn.MSELoss()(empty, empty).mean() is NaN.
        return jnp.float32(jnp.nan)
    inv_n = 1.0 / float(n_elem)

    # Flatten in native dtype (no wrapper-side astype; kernel casts to f32).
    a = pred.reshape(-1)
    b = target.reshape(-1)

    itemsize = max(jnp.dtype(pred.dtype).itemsize, jnp.dtype(target.dtype).itemsize)
    tm = _block_rows(itemsize)

    # Lane tail: only when n_elem isn't a multiple of 128 do we pay a pad copy
    # (rare for segmentation shapes).  Zero pads contribute (0-0)^2 = 0 to the
    # sum; the divisor below always uses the TRUE element count.
    lane_pad = (-n_elem) % LANES
    if lane_pad:
        a = jnp.concatenate([a, jnp.zeros((lane_pad,), a.dtype)])
        b = jnp.concatenate([b, jnp.zeros((lane_pad,), b.dtype)])
    m = a.size // LANES
    a2 = a.reshape(m, LANES)   # metadata-only when lane_pad == 0
    b2 = b.reshape(m, LANES)

    if m <= tm:
        # One grid step, full slab as one block, no scratch / pl.when.
        out = pl.pallas_call(
            _make_small_kernel(inv_n),
            out_shape=jax.ShapeDtypeStruct((1, 1), jnp.float32),
            grid=(1,),
            in_specs=[
                pl.BlockSpec((m, LANES), lambda i: (0, 0)),
                pl.BlockSpec((m, LANES), lambda i: (0, 0)),
            ],
            out_specs=pl.BlockSpec((1, 1), lambda i: (0, 0)),
        )(a2, b2)
        return out[0, 0]

    # Tiled path: no padding -- grid over ceil(m / tm) row blocks, split over
    # an always-2 "parallel" axis so both v7x TensorCores stream HBM.
    blocks = pl.cdiv(m, tm)
    cores = 2
    steps = pl.cdiv(blocks, cores)
    need_mask = (m % tm != 0) or (cores * steps != blocks)

    def in_map(c, s):
        # Clamp redundant / tail steps onto a valid block; the in-kernel row
        # mask zeroes their contribution.
        return (jnp.minimum(c * steps + s, blocks - 1), 0)

    out = pl.pallas_call(
        _make_tiled_kernel(tm, m, steps, need_mask),
        out_shape=jax.ShapeDtypeStruct((cores, 1, 1), jnp.float32),
        grid_spec=pltpu.PrefetchScalarGridSpec(
            num_scalar_prefetch=0,
            grid=(cores, steps),
            in_specs=[
                pl.BlockSpec((tm, LANES), in_map),
                pl.BlockSpec((tm, LANES), in_map),
            ],
            out_specs=pl.BlockSpec((1, 1, 1), lambda c, s: (c, 0, 0)),
            scratch_shapes=[pltpu.VMEM((8, LANES), jnp.float32)],
        ),
        compiler_params=pltpu.CompilerParams(
            # Leading axis shards across TensorCores on multi-TC chips (v7x);
            # the reduction axis stays "arbitrary" (resident accumulator).
            dimension_semantics=("parallel", "arbitrary"),
            # Double-buffered ~2 MiB blocks x 2 inputs + f32 intermediates:
            # raise v5e's 16 MiB default; 32 MiB is the v6e/v7x default.
            vmem_limit_bytes=32 * 1024 * 1024,
        ),
    )(a2, b2)
    # Combine the per-core partial sums and apply the true-count divisor.
    return jnp.sum(out) * jnp.float32(inv_n)


if __name__ == "__main__":
    key = jax.random.PRNGKey(0)
    k1, k2, k3, k4, k5, k6 = jax.random.split(key, 6)

    # Small NCHW inputs consistent with a segmentation embedding head.
    shape = (2, 4, 16, 16)
    embedding_pred = jax.random.normal(k1, shape, dtype=jnp.float32)
    embedding_target = jax.random.normal(k2, shape, dtype=jnp.float32)
    loss = jax.block_until_ready(mse_loss_pallas(embedding_pred, embedding_target))
    ref = jnp.mean((embedding_pred - embedding_target) ** 2)
    assert jnp.allclose(loss, ref, rtol=1e-5, atol=1e-6), (loss, ref)

    # Tiled path, evenly divisible (no in-kernel mask): 16384 rows -> 4 blocks.
    big_pred = jax.random.normal(k3, (4, 8, 256, 256), dtype=jnp.float32)
    big_target = jax.random.normal(k4, (4, 8, 256, 256), dtype=jnp.float32)
    big_loss = jax.block_until_ready(mse_loss_pallas(big_pred, big_target))
    big_ref = jnp.mean((big_pred - big_target) ** 2)
    assert jnp.allclose(big_loss, big_ref, rtol=5e-4, atol=1e-5), (big_loss, big_ref)

    # Tiled path, ragged row count (partial last block -> in-kernel row mask).
    rg_pred = jax.random.normal(k5, (3, 8, 200, 160), dtype=jnp.float32)
    rg_target = jax.random.normal(k6, (3, 8, 200, 160), dtype=jnp.float32)
    rg_loss = jax.block_until_ready(mse_loss_pallas(rg_pred, rg_target))
    rg_ref = jnp.mean((rg_pred - rg_target) ** 2)
    assert jnp.allclose(rg_loss, rg_ref, rtol=5e-4, atol=1e-5), (rg_loss, rg_ref)

    # Tiled path, odd block count (redundant clamped step is fully masked).
    od_pred = jax.random.normal(k1, (3, 8, 256, 256), dtype=jnp.float32)
    od_target = jax.random.normal(k2, (3, 8, 256, 256), dtype=jnp.float32)
    od_loss = jax.block_until_ready(mse_loss_pallas(od_pred, od_target))
    od_ref = jnp.mean((od_pred - od_target) ** 2)
    assert jnp.allclose(od_loss, od_ref, rtol=5e-4, atol=1e-5), (od_loss, od_ref)

    # Small path, element count not a multiple of 128 (pad fallback).
    nd_pred = jax.random.normal(k3, (2, 3, 7, 5), dtype=jnp.float32)
    nd_target = jax.random.normal(k4, (2, 3, 7, 5), dtype=jnp.float32)
    nd_loss = jax.block_until_ready(mse_loss_pallas(nd_pred, nd_target))
    nd_ref = jnp.mean((nd_pred - nd_target) ** 2)
    assert jnp.allclose(nd_loss, nd_ref, rtol=1e-5, atol=1e-6), (nd_loss, nd_ref)

    # Small path, bf16 inputs (in-kernel cast to f32, dtype-aware block rows).
    bf_pred = jax.random.normal(k5, shape, dtype=jnp.bfloat16)
    bf_target = jax.random.normal(k6, shape, dtype=jnp.bfloat16)
    bf_loss = jax.block_until_ready(mse_loss_pallas(bf_pred, bf_target))
    bf_ref = jnp.mean((bf_pred.astype(jnp.float32) - bf_target.astype(jnp.float32)) ** 2)
    assert jnp.allclose(bf_loss, bf_ref, rtol=1e-3, atol=1e-5), (bf_loss, bf_ref)

    print("KERNEL_OK")
</pallas_src>

<mosaic_0001>
module attributes {stable_mosaic.version = 11 : i64} {
  func.func @kernel(%arg0: i32, %arg1: memref<16x128xf32, #tpu.memory_space<vmem>>, %arg2: memref<16x128xf32, #tpu.memory_space<vmem>>, %arg3: memref<1x1xf32, #tpu.memory_space<vmem>>) attributes {dimension_semantics = [#tpu.dimension_semantics<arbitrary>], iteration_bounds = array<i64: 1>, scalar_prefetch = 0 : i64, scratch_operands = 0 : i64, tpu.core_type = #tpu.core_type<tc>, window_params = [{pipeline_mode = #tpu.pipeline_mode<synchronous>, transform_indices = @transform_0, window_bounds = array<i64: 16, 128>}, {pipeline_mode = #tpu.pipeline_mode<synchronous>, transform_indices = @transform_1, window_bounds = array<i64: 16, 128>}, {pipeline_mode = #tpu.pipeline_mode<synchronous>, transform_indices = @transform_2, window_bounds = array<i64: 1, 1>}]} {
    %c0 = arith.constant 0 : index
    %c0_0 = arith.constant 0 : index
    %0 = vector.load %arg1[%c0, %c0_0] : memref<16x128xf32, #tpu.memory_space<vmem>>, vector<16x128xf32>
    %c0_1 = arith.constant 0 : index
    %c0_2 = arith.constant 0 : index
    %1 = vector.load %arg2[%c0_1, %c0_2] : memref<16x128xf32, #tpu.memory_space<vmem>>, vector<16x128xf32>
    %2 = arith.subf %0, %1 : vector<16x128xf32>
    %3 = arith.mulf %2, %2 : vector<16x128xf32>
    %4 = vector.shape_cast %3 : vector<16x128xf32> to vector<1x16x128xf32>
    %cst = arith.constant dense<0.000000e+00> : vector<1xf32>
    %5 = vector.multi_reduction <add>, %4, %cst [1, 2] : vector<1x16x128xf32> to vector<1xf32>
    %6 = vector.shape_cast %5 : vector<1xf32> to vector<1x1x1xf32>
    %7 = vector.extract %6[0, 0, 0] : f32 from vector<1x1x1xf32>
    %cst_3 = arith.constant 4.8828125E-4 : f32
    %8 = arith.mulf %7, %cst_3 : f32
    %9 = vector.broadcast %8 : f32 to vector<1x1xf32>
    %c0_4 = arith.constant 0 : index
    %c0_5 = arith.constant 0 : index
    %10 = vector.load %arg3[%c0_4, %c0_5] : memref<1x1xf32, #tpu.memory_space<vmem>>, vector<1x1xf32>
    tpu.vector_store %arg3[%c0_4, %c0_5], %9 {strides = array<i32>} : memref<1x1xf32, #tpu.memory_space<vmem>>, vector<1x1xf32>,
    return
  }
  func.func @transform_0(%arg0: i32) -> (i32, i32) {
    %c0_i32 = arith.constant 0 : i32
    %c0_i32_0 = arith.constant 0 : i32
    %c0_i32_1 = arith.constant 0 : i32
    return %c0_i32, %c0_i32_0 : i32, i32
  }
  func.func @transform_1(%arg0: i32) -> (i32, i32) {
    %c0_i32 = arith.constant 0 : i32
    %c0_i32_0 = arith.constant 0 : i32
    %c0_i32_1 = arith.constant 0 : i32
    return %c0_i32, %c0_i32_0 : i32, i32
  }
  func.func @transform_2(%arg0: i32) -> (i32, i32) {
    %c0_i32 = arith.constant 0 : i32
    %c0_i32_0 = arith.constant 0 : i32
    %c0_i32_1 = arith.constant 0 : i32
    return %c0_i32, %c0_i32_0 : i32, i32
  }
}

</mosaic_0001>

<bundles_post_ra>
// kernel: tpu_custom_call.1
= control target key start
LH: loop header
LB: loop body
LE: loop exit
PB: predicated region body
PF: predicated region fallthrough
CT: control target
= control target key end

     0   :  { %7 = vsyncpa [#allocation3], 0  ;;  %s180_s0 = inlined_call_operand.hbm [shape: f32[16,128], index: 0, kind: input, shape index: {}]   ;;  %s181_s1 = inlined_call_operand.hbm [shape: f32[16,128], index: 1, kind: input, shape index: {}]   ;;  %s182_s2 = inlined_call_operand.hbm [shape: f32[1,1], index: 2, kind: output, shape index: {}]  }
   0x1   :  { %8 = vsyncpa [#allocation6], 0 }
   0x2   :  { %9 = vsyncpa [#allocation4], 0  ;;  %s151_s9 = smov [#allocation2]  }
   0x3   :  { %s15_s10 = sshll.u32 %s151_s9, 4  ;;  %s16_s10 = int_to_ptr.vmem [resolvable:$true] %s15_s10 }
   0x4   :  { %s93_s11 = scalar_lea.vmem %s16_s10, 256  ;;  %p98_p1 = scmp.lt.s32.totalorder %s16_s10, %s16_s10 }
   0x5   :  { %p94_p0 = scmp.ne.s32.totalorder %s16_s10, %s93_s11  ;;  %p99_p2 = scmp.lt.s32.totalorder %s93_s11, %s93_s11 }
   0x7   :  { %p100_p3 = por %p99_p2, %p98_p1 }
   0x9   :  { %p101_p4 = pnand %p100_p3, %p94_p0 }
   0xb   :  { %104 = shalt.err (!%p101_p4)
}
   0xc   :  { %s152_s12 = smov 128   ;;  %s153_s13 = smov 8  }
   0xd   :  { %21 = dma.hbm_to_vmem [thread:$0]  %s180_s0, 256, %s16_s10, [#allocation3], %s152_s12, %s152_s12, %s153_s13  }
   0xe   :  { %s154_s16 = smov [#allocation5]  }
   0xf   :  { %s27_s17 = sshll.u32 %s154_s16, 4  ;;  %s28_s17 = int_to_ptr.vmem [resolvable:$true] %s27_s17 }
  0x10   :  { %s113_s18 = scalar_lea.vmem %s28_s17, 256  ;;  %p118_p6 = scmp.lt.s32.totalorder %s28_s17, %s28_s17 }
  0x11   :  { %p114_p5 = scmp.ne.s32.totalorder %s28_s17, %s113_s18  ;;  %p119_p7 = scmp.lt.s32.totalorder %s113_s18, %s113_s18 }
  0x13   :  { %p120_p8 = por %p119_p7, %p118_p6 }
  0x15   :  { %p121_p9 = pnand %p120_p8, %p114_p5 }
  0x17   :  { %124 = shalt.err (!%p121_p9)
}
  0x18   :  { %33 = dma.hbm_to_vmem [thread:$0]  %s181_s1, 256, %s28_s17, [#allocation6], %s152_s12, %s152_s12, %s153_s13  }
  0x19   :  { %145 = dma.done.wait [#allocation3], 256  }
  0x1a   :  { %146 = vsyncadd [#allocation3], 4294967040 }
  0x1b   :  { %147 = dma.done.wait [#allocation6], 256  }
  0x1c   :  { %148 = vsyncadd [#allocation6], 4294967040  ;;  %v40_v0 = vld [vmem:[#allocation2] sm:$0xff]  ;;  %v41_v1 = vld [vmem:[#allocation2 + $0x8] sm:$0xff]  ;;  %s155_s0 = smov [#allocation7]   ;;  %vm60_vm0 = vcmask 0  }
  0x1d   :  { %v42_v2 = vld [vmem:[#allocation5] sm:$0xff]  ;;  %v43_v3 = vld [vmem:[#allocation5 + $0x8] sm:$0xff]  ;;  %s68_s1 = sshll.u32 %s155_s0, 4  ;;  %s69_s1 = int_to_ptr.vmem [resolvable:$true] %s68_s1 }
  0x1e   :  { %v44_v4 = vsub.f32 %v40_v0, %v42_v2  ;;  %v45_v5 = vsub.f32 %v41_v1, %v43_v3  ;;  %s125_s23 = scalar_lea.vmem %s69_s1, 16  ;;  %s129_s24 = scalar_lea.vmem %s69_s1, 32 }
  0x1f   :  { %p126_p10 = scmp.ne.s32.totalorder %s69_s1, %s125_s23  ;;  %p130_p11 = scmp.lt.s32.totalorder %s69_s1, %s69_s1 }
  0x20   :  { %v46_v6 = vmul.f32 %v44_v4, %v44_v4  ;;  %v47_v7 = vmul.f32 %v45_v5, %v45_v5  ;;  %p131_p12 = scmp.lt.s32.totalorder %s129_s24, %s125_s23 }
  0x22   :  { %v48_v8 = vadd.f32 %v47_v7, %v46_v6  ;;  %p132_p13 = por %p131_p12, %p130_p11 }
  0x24   :  { %49 = vadd.xlane.f32.xlu0 %v48_v8  ;;  %p133_p0 = pnand %p132_p13, %p126_p10 }
  0xad   :  { %v50_v9 = vpop.xlane.xlu0 %49 }
  0xae   :  { %v51_v10 = vrot.slane %v50_v9, 4 }
  0xb0   :  { %v52_v11 = vadd.f32 %v51_v10, %v50_v9 }
  0xb2   :  { %v53_v12 = vrot.slane %v52_v11, 2 }
  0xb4   :  { %v54_v13 = vadd.f32 %v53_v12, %v52_v11 }
  0xb6   :  { %v55_v14 = vrot.slane %v54_v13, 1 }
  0xb8   :  { %v56_v15 = vadd.f32 %v55_v14, %v54_v13 }
  0xba   :  { %78 = vpush %v56_v15 }
  0xeb   :  { %s79_s21 = spop %78 }
  0xec   :  { %s58_s22 = smul.f32 0.00048828125, %s79_s21 }
  0xee   :  { %v59_v16 = vstv %s58_s22 }
  0xef   :  { %61 = vst.msk [vmem:[#allocation7] sm:$0x1] %vm60_vm0, %v59_v16 }
  0xf0   :  { %136 = shalt.err (!%p133_p0)
}
  0xf1   :  { %71 = dma.vmem_to_hbm [thread:$0]  %s69_s1, 16, %s182_s2, [#allocation4]  }
  0xf2   :  { %149 = dma.done.wait [#allocation4], 16  }
  0xf3   :  { %150 = vsyncadd [#allocation4], 4294967280 }
  0xf4   :  { %75 = vsyncpa [#allocation3], 1 }
  0xf5   :  { %76 = vsyncpa [#allocation6], 1 }
  0xf6   :  { %77 = vsyncpa [#allocation4], 1 }

</bundles_post_ra>
